<compile_context>
chip_gen: v5e
topology: v5e:2x2
jax: 0.10.0
libtpu: 0.0.40
codegen_flags: <defaults>
</compile_context>

<pallas_src>
import functools

import jax
import jax.numpy as jnp
from jax.experimental import pallas as pl
from jax.experimental.pallas import tpu as pltpu

# Model sizes (the PyTorch module references globals Din, H, Dout).
Din, H, Dout = 32, 64, 16


def _round_up(n, m):
    return (n + m - 1) // m * m


@functools.lru_cache(maxsize=1)
def _vmem_limit_bytes():
    """Scoped-VMEM limit derived per chip generation, with headroom for compiler scratch."""
    cap = 64 << 20  # v7x worst case
    try:
        info = pltpu.get_tpu_info()
        cap = getattr(info, "vmem_capacity_bytes", None) or cap
    except Exception:
        pass
    return int(cap * 3 // 4)   # 48 MiB on v7x, 96 MiB on v5e/v6e


def _sigmoid_f32(x):
    # One EUP push per element (tanh); the mul/add go to otherwise-idle VALU slots.
    return 0.5 * jnp.tanh(0.5 * x) + 0.5


# --------------------------------------------------------------------------- #
# Kernel (shared by the grid-less small-batch path and the batch-tiled path). #
# --------------------------------------------------------------------------- #
def mlp_kernel(x_ref, w1_ref, w2_ref, o_ref):
    # x_ref:  (TB, Din)   f32 (native input dtype; cast to MXU dtype in-kernel)
    # w1_ref: (Din, Hp)   compute dtype (f32 or bf16), Hp = 128-padded hidden dim
    # w2_ref: (Hp, Dout)  compute dtype, output dim UNpadded
    # o_ref:  (TB, Dout)  out_dtype (f32 or bf16)
    x = x_ref[...].astype(w1_ref.dtype)                     # in-kernel cast (free on VPU)
    h = jnp.dot(x, w1_ref[...], preferred_element_type=jnp.float32)
    h = _sigmoid_f32(h)                                     # f32 sigmoid (v5e-safe)
    h = h.astype(w2_ref.dtype)                              # bf16 only on the bf16 path
    y = jnp.dot(h, w2_ref[...], preferred_element_type=jnp.float32)
    o_ref[...] = _sigmoid_f32(y).astype(o_ref.dtype)


# --------------------------------------------------------------------------- #
# One-time parameter preparation (transpose to (in, out); zero-pad hidden dim).#
# --------------------------------------------------------------------------- #
def prepare_params(theta1, theta2, compute_dtype=jnp.float32):
    """theta1: (H, Din), theta2: (Dout, H)  -- PyTorch nn.Linear weight layout."""
    h_dim, din = theta1.shape
    dout, _ = theta2.shape
    h_p = _round_up(h_dim, 128)
    w1_p = jnp.zeros((din, h_p), compute_dtype).at[:, :h_dim].set(
        theta1.T.astype(compute_dtype))
    # Zero rows beyond h_dim cancel the sigmoid(0)=0.5 activations of padded hidden lanes.
    w2_p = jnp.zeros((h_p, dout), compute_dtype).at[:h_dim, :].set(
        theta2.T.astype(compute_dtype))
    return w1_p, w2_p


# --------------------------------------------------------------------------- #
# Forward wrapper.                                                            #
# --------------------------------------------------------------------------- #
@functools.partial(jax.jit, static_argnames=("block_b", "out_dtype"))
def net_forward(x, w1_p, w2_p, *, block_b=8192, out_dtype=jnp.float32):
    """x: (B, Din) f32; w1_p: (Din, Hp); w2_p: (Hp, Dout) -> (B, Dout) out_dtype."""
    B, din = x.shape
    h_p = w1_p.shape[1]
    dout = w2_p.shape[1]

    if B <= min(block_b, 1024):
        # Small batch: whole problem is one VMEM-resident block -- no grid, no
        # software pipeline, no double-buffering.
        return pl.pallas_call(
            mlp_kernel,
            out_shape=jax.ShapeDtypeStruct((B, dout), out_dtype),
            in_specs=[
                pl.BlockSpec(memory_space=pltpu.MemorySpace.VMEM),
                pl.BlockSpec(memory_space=pltpu.MemorySpace.VMEM),
                pl.BlockSpec(memory_space=pltpu.MemorySpec.VMEM)
                if False else pl.BlockSpec(memory_space=pltpu.MemorySpace.VMEM),
            ],
            out_specs=pl.BlockSpec(memory_space=pltpu.MemorySpace.VMEM),
        )(x, w1_p, w2_p)

    # Large batch: tile the batch, keep the (tiny) weights resident in VMEM, shard the
    # parallel batch axis across TensorCores. Ensure >=4 grid steps for mid-size B.
    tb = min(block_b, max(8, _round_up(pl.cdiv(B, 4), 8)))
    grid = (pl.cdiv(B, tb),)   # last block may be partial: OOB reads are garbage on
                               # independent rows, OOB writes are masked by Pallas.
    return pl.pallas_call(
        mlp_kernel,
        out_shape=jax.ShapeDtypeStruct((B, dout), out_dtype),
        grid=grid,
        in_specs=[
            pl.BlockSpec((tb, din), lambda i: (i, 0)),
            pl.BlockSpec((din, h_p), lambda i: (0, 0)),     # weights resident
            pl.BlockSpec((h_p, dout), lambda i: (0, 0)),    # weights resident
        ],
        out_specs=pl.BlockSpec((tb, dout), lambda i: (i, 0)),
        compiler_params=pltpu.CompilerParams(
            dimension_semantics=("parallel",),               # 2x on v7x dual-TC
            vmem_limit_bytes=_vmem_limit_bytes(),            # per-generation headroom
        ),
    )(x, w1_p, w2_p)


def reference_forward(x, theta1, theta2):
    return jax.nn.sigmoid(jax.nn.sigmoid(x @ theta1.T) @ theta2.T)


if __name__ == "__main__":
    key = jax.random.PRNGKey(0)
    kx, k1, k2, kb = jax.random.split(key, 4)

    B = 8
    x = jax.random.normal(kx, (B, Din), dtype=jnp.float32)

    # Deterministic params in PyTorch nn.Linear layout: theta1 (H, Din), theta2 (Dout, H).
    theta1 = jax.random.normal(k1, (H, Din), dtype=jnp.float32) * 0.1
    theta2 = jax.random.normal(k2, (Dout, H), dtype=jnp.float32) * 0.1

    ref = reference_forward(x, theta1, theta2)

    # --- f32 path, small-batch (grid-less) kernel ---------------------------------
    w1_f32, w2_f32 = prepare_params(theta1, theta2, compute_dtype=jnp.float32)
    out = jax.block_until_ready(net_forward(x, w1_f32, w2_f32))
    assert out.shape == (B, Dout)
    assert jnp.allclose(out, ref, atol=1e-5, rtol=1e-5)

    # --- f32 path, batch-tiled kernel with a partial last block -------------------
    # B=40, tb=16 -> grid of 3 steps; last step has only 8 real rows (masked store).
    x_big = jax.random.normal(kb, (40, Din), dtype=jnp.float32)
    ref_big = reference_forward(x_big, theta1, theta2)
    out_big = jax.block_until_ready(net_forward(x_big, w1_f32, w2_f32, block_b=16))
    assert out_big.shape == (40, Dout)
    assert jnp.allclose(out_big, ref_big, atol=1e-5, rtol=1e-5)

    # --- bf16 MXU-input path (f32 accumulation + f32 sigmoids), bf16 writeback ----
    w1_bf16, w2_bf16 = prepare_params(theta1, theta2, compute_dtype=jnp.bfloat16)
    out_bf16 = jax.block_until_ready(
        net_forward(x, w1_bf16, w2_bf16, out_dtype=jnp.bfloat16))
    assert out_bf16.shape == (B, Dout)
    assert jnp.allclose(out_bf16.astype(jnp.float32), ref, atol=3e-2, rtol=3e-2)

    print("KERNEL_OK")
</pallas_src>

<mosaic_0001>
module attributes {stable_mosaic.version = 11 : i64} {
  func.func @mlp_kernel(%arg0: memref<8x32xf32, #tpu.memory_space<vmem>>, %arg1: memref<32x128xf32, #tpu.memory_space<vmem>>, %arg2: memref<128x16xf32, #tpu.memory_space<vmem>>, %arg3: memref<8x16xf32, #tpu.memory_space<vmem>>) attributes {dimension_semantics = [], scalar_prefetch = 0 : i64, scratch_operands = 0 : i64, tpu.core_type = #tpu.core_type<tc>} {
    %c0 = arith.constant 0 : index
    %c0_0 = arith.constant 0 : index
    %0 = vector.load %arg0[%c0, %c0_0] : memref<8x32xf32, #tpu.memory_space<vmem>>, vector<8x32xf32>
    %c0_1 = arith.constant 0 : index
    %c0_2 = arith.constant 0 : index
    %1 = vector.load %arg1[%c0_1, %c0_2] : memref<32x128xf32, #tpu.memory_space<vmem>>, vector<32x128xf32>
    %cst = arith.constant dense<0.000000e+00> : vector<8x128xf32>
    %2 = tpu.matmul %0, %1, %cst {dimension_numbers = #tpu.dot_dimension_numbers<[1], [0], [0], [1], [0, 0, 1, 1], [], []>} : vector<8x32xf32>, vector<32x128xf32>, vector<8x128xf32> -> vector<8x128xf32>
    %cst_3 = arith.constant 5.000000e-01 : f32
    %3 = vector.broadcast %cst_3 : f32 to vector<8x128xf32>
    %4 = arith.mulf %3, %2 : vector<8x128xf32>
    %5 = math.tanh %4 : vector<8x128xf32>
    %cst_4 = arith.constant 5.000000e-01 : f32
    %6 = vector.broadcast %cst_4 : f32 to vector<8x128xf32>
    %7 = arith.mulf %6, %5 : vector<8x128xf32>
    %cst_5 = arith.constant 5.000000e-01 : f32
    %8 = vector.broadcast %cst_5 : f32 to vector<8x128xf32>
    %9 = arith.addf %7, %8 : vector<8x128xf32>
    %c0_6 = arith.constant 0 : index
    %c0_7 = arith.constant 0 : index
    %10 = vector.load %arg2[%c0_6, %c0_7] : memref<128x16xf32, #tpu.memory_space<vmem>>, vector<128x16xf32>
    %cst_8 = arith.constant dense<0.000000e+00> : vector<8x16xf32>
    %11 = tpu.matmul %9, %10, %cst_8 {dimension_numbers = #tpu.dot_dimension_numbers<[1], [0], [0], [1], [0, 0, 1, 1], [], []>} : vector<8x128xf32>, vector<128x16xf32>, vector<8x16xf32> -> vector<8x16xf32>
    %cst_9 = arith.constant 5.000000e-01 : f32
    %12 = vector.broadcast %cst_9 : f32 to vector<8x16xf32>
    %13 = arith.mulf %12, %11 : vector<8x16xf32>
    %14 = math.tanh %13 : vector<8x16xf32>
    %cst_10 = arith.constant 5.000000e-01 : f32
    %15 = vector.broadcast %cst_10 : f32 to vector<8x16xf32>
    %16 = arith.mulf %15, %14 : vector<8x16xf32>
    %cst_11 = arith.constant 5.000000e-01 : f32
    %17 = vector.broadcast %cst_11 : f32 to vector<8x16xf32>
    %18 = arith.addf %16, %17 : vector<8x16xf32>
    %c0_12 = arith.constant 0 : index
    %c0_13 = arith.constant 0 : index
    %19 = vector.load %arg3[%c0_12, %c0_13] : memref<8x16xf32, #tpu.memory_space<vmem>>, vector<8x16xf32>
    tpu.vector_store %arg3[%c0_12, %c0_13], %18 {strides = array<i32>} : memref<8x16xf32, #tpu.memory_space<vmem>>, vector<8x16xf32>,
    return
  }
}

</mosaic_0001>

<bundles_post_ra>
// kernel: net_forward.1
= control target key start
LH: loop header
LB: loop body
LE: loop exit
PB: predicated region body
PF: predicated region fallthrough
CT: control target
= control target key end

     0   :  { %s225_s0 = inlined_call_operand.vmem [shape: f32[8,32], index: 0, kind: input, shape index: {}]   ;;  %s226_s1 = inlined_call_operand.vmem [shape: f32[32,128], index: 1, kind: input, shape index: {}]   ;;  %s227_s2 = inlined_call_operand.vmem [shape: f32[128,16], index: 2, kind: input, shape index: {}]   ;;  %s228_s3 = inlined_call_operand.hbm [shape: f32[8,16], index: 3, kind: output, shape index: {}]  }
   0x1   :  { %v19_v0 = vld [vmem:[%s226_s1 + $0x18] sm:$0xff]  ;;  %v18_v1 = vld [vmem:[%s226_s1 + $0x10] sm:$0xff]  ;;  %v17_v3 = vld [vmem:[%s226_s1 + $0x8] sm:$0xff] }
   0x2   :  { %36 = vmatpush.msra.mxu0 %v19_v0  ;;  %v63_v2 = vld [vmem:[%s227_s2 + $0x78] sm:$0xff]  ;;  %v62_v4 = vld [vmem:[%s227_s2 + $0x70] sm:$0xff]  ;;  %v61_v5 = vld [vmem:[%s227_s2 + $0x68] sm:$0xff] }
   0x3   :  { %64 = vmatpush.msra.mxu1 %v63_v2  ;;  %v16_v6 = vld [vmem:[%s226_s1] sm:$0xff] }
   0x4   :  { %37 = vmatpush.msra.mxu0 %v18_v1 }
   0x5   :  { %65 = vmatpush.msra.mxu1 %v62_v4 }
   0x6   :  { %8 = vsyncpa [#allocation3], 0  ;;  %38 = vmatpush.msra.mxu0 %v17_v3  ;;  %v15_v7 = vld [vmem:[%s225_s0] sm:$0xff]  ;;  %vm20_vm0 = vcmask 261120   ;;  %v59_v9 = vld [vmem:[%s227_s2 + $0x58] sm:$0xff]  ;;  %s138_s25 = smov [#allocation2]  }
   0x7   :  { %v60_v8 = vld [vmem:[%s227_s2 + $0x60] sm:$0xff]  ;;  %66 = vmatpush.msra.mxu1 %v61_v5  ;;  %v58_v10 = vld [vmem:[%s227_s2 + $0x50] sm:$0xff]  ;;  %v57_v11 = vld [vmem:[%s227_s2 + $0x48] sm:$0xff]  ;;  %s95_s26 = sshll.u32 %s138_s25, 4  ;;  %s97_s29 = sshll.u32 %s228_s3, 4  ;;  %vm88_vm1 = vcmask 130048   ;;  %s96_s26 = int_to_ptr.vmem [resolvable:$true] %s95_s26  ;;  %s98_s29 = int_to_ptr.hbm [resolvable:$true] %s97_s29 }
   0x8   :  { %39 = vmatpush.msra.mxu0 %v16_v6  ;;  %v56_v12 = vld [vmem:[%s227_s2 + $0x40] sm:$0xff]  ;;  %v55_v13 = vld [vmem:[%s227_s2 + $0x38] sm:$0xff]  ;;  %v54_v14 = vld [vmem:[%s227_s2 + $0x30] sm:$0xff] }
   0x9   :  { %106 = vmatmul.msk.f32.vlgmr.msra.gmra.mxu0 %vm20_vm0, %v15_v7  ;;  %67 = vmatpush.msra.mxu1 %v60_v8  ;;  %v53_v15 = vld [vmem:[%s227_s2 + $0x28] sm:$0xff]  ;;  %v52_v16 = vld [vmem:[%s227_s2 + $0x20] sm:$0xff]  ;;  %v51_v17 = vld [vmem:[%s227_s2 + $0x18] sm:$0xff] }
   0xa   :  { %v50_v18 = vld [vmem:[%s227_s2 + $0x10] sm:$0xff]  ;;  %v49_v19 = vld [vmem:[%s227_s2 + $0x8] sm:$0xff]  ;;  %v48_v20 = vld [vmem:[%s227_s2] sm:$0xff] }
   0xb   :  { %68 = vmatpush.msra.mxu1 %v59_v9 }
   0xd   :  { %69 = vmatpush.msra.mxu1 %v58_v10 }
   0xf   :  { %70 = vmatpush.msra.mxu1 %v57_v11 }
  0x11   :  { %71 = vmatpush.msra.mxu1 %v56_v12 }
  0x13   :  { %72 = vmatpush.msra.mxu1 %v55_v13 }
  0x15   :  { %73 = vmatpush.msra.mxu1 %v54_v14 }
  0x17   :  { %74 = vmatpush.msra.mxu1 %v53_v15 }
  0x19   :  { %75 = vmatpush.msra.mxu1 %v52_v16 }
  0x1b   :  { %76 = vmatpush.msra.mxu1 %v51_v17 }
  0x1d   :  { %77 = vmatpush.msra.mxu1 %v50_v18 }
  0x1f   :  { %78 = vmatpush.msra.mxu1 %v49_v19 }
  0x21   :  { %79 = vmatpush.msra.mxu1 %v48_v20 }
  0x86   :  { %v41_v21 = vpop.f32.mrf.mxu0 }
  0x87   :  { %v44_v22 = vmul.f32 0.5, %v41_v21 }
  0x89   :  { %108 = vtanh.f32 %v44_v22 }
  0x8f   :  { %v109_v23 = vpop.eup %108 }
  0x90   :  { %v46_v24 = vmul.f32 0.5, %v109_v23 }
  0x92   :  { %v47_v25 = vadd.f32 0.5, %v46_v24 }
  0x94   :  { %80 = vmatmul.f32.vlgmr.msra.gmra.mxu1 %v47_v25 }
 0x111   :  { %v81_v26 = vpop.f32.mrf.mxu1 }
 0x112   :  { %v84_v27 = vmul.f32 0.5, %v81_v26 }
 0x114   :  { %110 = vtanh.f32 %v84_v27 }
 0x11a   :  { %v111_v28 = vpop.eup %110 }
 0x11b   :  { %v86_v29 = vmul.f32 0.5, %v111_v28 }
 0x11d   :  { %v87_v30 = vadd.f32 0.5, %v86_v29 }
 0x11f   :  { %89 = vst.msk [vmem:[#allocation2] sm:$0xff] %vm88_vm1, %v87_v30 }
 0x120   :  { %100 = dma.vmem_to_hbm [thread:$0]  %s96_s26, 128, %s98_s29, [#allocation3]  }
 0x121   :  { %136 = dma.done.wait [#allocation3], 128  }
 0x122   :  { %137 = vsyncadd [#allocation3], 4294967168 }
 0x123   :  { %105 = vsyncpa [#allocation3], 1 }

</bundles_post_ra>
